<compile_context>
chip_gen: v6e
topology: v6e:2x2x1
jax: 0.10.0
libtpu: 0.0.40
codegen_flags: <defaults>
</compile_context>

<pallas_src>
import math

import numpy as np
import jax
import jax.numpy as jnp
from jax.experimental import pallas as pl
from jax.experimental.pallas import tpu as pltpu


def _self_attention_kernel(x_ref, w_v_t_ref, b_v_ref, w_out_t_ref, b_out_ref, o_ref):
    # x_ref:       (rows, D)  flattened (b, l) rows of this block
    # w_v_t_ref:   (D, D)     v-rows of in_proj weight, head-reordered, transposed
    # b_v_ref:     (1, D)     matching bias slice
    # w_out_t_ref: (D, D)     out_proj weight^T
    # b_out_ref:   (1, D)
    # o_ref:       (rows, D)
    v = jnp.dot(x_ref[...], w_v_t_ref[...], preferred_element_type=jnp.float32)
    v = v + b_v_ref[...]                                   # == opt (softmax row-sum is 1)
    out = jnp.dot(v, w_out_t_ref[...], preferred_element_type=jnp.float32)
    out = out + b_out_ref[...]
    o_ref[...] = out.astype(o_ref.dtype)
    # TODO(synk): causal_mask=True path (triu(1) over the trailing (m, h) dims of
    # att) is not implemented; the module's default causal_mask=False is reproduced.


def prepare_self_attention_params(w_in, b_in, w_out, b_out, n_heads, d_embed):
    """One-time (per module) weight prep, hoisted out of the per-forward path.

    Selects the v rows of in_proj and re-orders them so output column
    h*d_head + j corresponds to in_proj feature h*3*d_head + 2*d_head + j,
    matching the PyTorch view/chunk/view sequence.
    """
    d_head = d_embed // n_heads
    v_rows = np.concatenate([
        np.arange(h * 3 * d_head + 2 * d_head, h * 3 * d_head + 3 * d_head)
        for h in range(n_heads)
    ]).astype(np.int32)
    w_v_t = jnp.asarray(w_in)[v_rows].T                    # (D, D)
    b_v = jnp.asarray(b_in)[v_rows].reshape(1, d_embed)    # (1, D)
    w_out_t = jnp.asarray(w_out).T                         # (D, D)
    b_out2 = jnp.asarray(b_out).reshape(1, d_embed)        # (1, D)
    return w_v_t, b_v, w_out_t, b_out2


def self_attention_pallas(x, prepared_params, num_row_blocks=None):
    B, L, D = x.shape
    M = B * L
    w_v_t, b_v, w_out_t, b_out2 = prepared_params

    if num_row_blocks is None:
        # One step at small sizes (fixed per-step overhead dominates); >=2 parallel
        # steps only when there are enough rows to occupy both v7x TensorCores.
        num_row_blocks = 2 if (M >= 2048 and (M // 2) % 8 == 0) else 1
    assert M % num_row_blocks == 0
    rows = M // num_row_blocks
    # Block second-to-last dim must be a multiple of 8 or the full extent.
    assert rows == M or rows % 8 == 0

    flops = 2 * M * D * D + 2 * M * D * D                  # two (M,D)@(D,D) dots
    bytes_accessed = 4 * (2 * M * D + 2 * D * D + 2 * D)
    cost = pl.CostEstimate(flops=flops, transcendentals=0,
                           bytes_accessed=bytes_accessed)

    out2d = pl.pallas_call(
        _self_attention_kernel,
        out_shape=jax.ShapeDtypeStruct((M, D), x.dtype),
        grid=(num_row_blocks,),
        in_specs=[
            pl.BlockSpec((rows, D), lambda i: (i, 0)),     # x rows of this block
            pl.BlockSpec((D, D), lambda i: (0, 0)),        # in_proj v-slab W^T (resident)
            pl.BlockSpec((1, D), lambda i: (0, 0)),        # in_proj v-slab bias
            pl.BlockSpec((D, D), lambda i: (0, 0)),        # out_proj W^T
            pl.BlockSpec((1, D), lambda i: (0, 0)),        # out_proj bias
        ],
        out_specs=pl.BlockSpec((rows, D), lambda i: (i, 0)),
        compiler_params=pltpu.CompilerParams(dimension_semantics=("parallel",)),
        cost_estimate=cost,
    )(x.reshape(M, D), w_v_t, b_v, w_out_t, b_out2)

    return out2d.reshape(B, L, D)                          # free reshape


def self_attention_reference(x, w_in, b_in, w_out, b_out, n_heads):
    """Pure-JAX transcription of the PyTorch forward (causal_mask=False)."""
    b, l, d = x.shape
    x_proj = x @ w_in.T + b_in
    x_proj = x_proj.reshape(b, l, n_heads, -1)
    q, k, v = jnp.split(x_proj, 3, axis=-1)
    att = jnp.einsum('blhd,bmhd->blmh', q, k) / math.sqrt(d // n_heads)
    att = jax.nn.softmax(att, axis=2)
    opt = jnp.einsum('blmh,blhd->blhd', att, v).reshape(b, l, d)
    return opt @ w_out.T + b_out


if __name__ == "__main__":
    B, L, D, H = 2, 8, 32, 4   # batch, seq, d_embed, n_heads (d_head = 8)

    key = jax.random.PRNGKey(0)
    kx, k1, k2, k3, k4 = jax.random.split(key, 5)

    x = jax.random.normal(kx, (B, L, D), dtype=jnp.float32)

    # Deterministic parameter init (uniform, like nn.Linear's default range).
    bound_in = 1.0 / math.sqrt(D)
    w_in = jax.random.uniform(k1, (3 * D, D), jnp.float32, -bound_in, bound_in)
    b_in = jax.random.uniform(k2, (3 * D,), jnp.float32, -bound_in, bound_in)
    w_out = jax.random.uniform(k3, (D, D), jnp.float32, -bound_in, bound_in)
    b_out = jax.random.uniform(k4, (D,), jnp.float32, -bound_in, bound_in)

    # Weight prep done once (hoisted out of the per-forward path).
    params = prepare_self_attention_params(w_in, b_in, w_out, b_out, H, D)

    out = self_attention_pallas(x, params)
    out = jax.block_until_ready(out)

    ref = self_attention_reference(x, w_in, b_in, w_out, b_out, n_heads=H)
    assert out.shape == (B, L, D)
    assert jnp.allclose(out, ref, atol=1e-5, rtol=1e-5), "mismatch vs reference"

    print("KERNEL_OK")
</pallas_src>

<mosaic_0001>
module attributes {stable_mosaic.version = 11 : i64} {
  func.func @_self_attention_kernel(%arg0: i32, %arg1: memref<16x32xf32, #tpu.memory_space<vmem>>, %arg2: memref<32x32xf32, #tpu.memory_space<vmem>>, %arg3: memref<1x32xf32, #tpu.memory_space<vmem>>, %arg4: memref<32x32xf32, #tpu.memory_space<vmem>>, %arg5: memref<1x32xf32, #tpu.memory_space<vmem>>, %arg6: memref<16x32xf32, #tpu.memory_space<vmem>>) attributes {dimension_semantics = [#tpu.dimension_semantics<parallel>], iteration_bounds = array<i64: 1>, scalar_prefetch = 0 : i64, scratch_operands = 0 : i64, tpu.core_type = #tpu.core_type<tc>, window_params = [{transform_indices = @transform_0, window_bounds = array<i64: 16, 32>}, {pipeline_mode = #tpu.pipeline_mode<synchronous>, transform_indices = @transform_1, window_bounds = array<i64: 32, 32>}, {pipeline_mode = #tpu.pipeline_mode<synchronous>, transform_indices = @transform_2, window_bounds = array<i64: 1, 32>}, {pipeline_mode = #tpu.pipeline_mode<synchronous>, transform_indices = @transform_3, window_bounds = array<i64: 32, 32>}, {pipeline_mode = #tpu.pipeline_mode<synchronous>, transform_indices = @transform_4, window_bounds = array<i64: 1, 32>}, {transform_indices = @transform_5, window_bounds = array<i64: 16, 32>}]} {
    %c0 = arith.constant 0 : index
    %c0_0 = arith.constant 0 : index
    %0 = vector.load %arg1[%c0, %c0_0] : memref<16x32xf32, #tpu.memory_space<vmem>>, vector<16x32xf32>
    %c0_1 = arith.constant 0 : index
    %c0_2 = arith.constant 0 : index
    %1 = vector.load %arg2[%c0_1, %c0_2] : memref<32x32xf32, #tpu.memory_space<vmem>>, vector<32x32xf32>
    %cst = arith.constant dense<0.000000e+00> : vector<16x32xf32>
    %2 = tpu.matmul %0, %1, %cst {dimension_numbers = #tpu.dot_dimension_numbers<[1], [0], [0], [1], [0, 0, 1, 1], [], []>} : vector<16x32xf32>, vector<32x32xf32>, vector<16x32xf32> -> vector<16x32xf32>
    %c0_3 = arith.constant 0 : index
    %c0_4 = arith.constant 0 : index
    %3 = vector.load %arg3[%c0_3, %c0_4] : memref<1x32xf32, #tpu.memory_space<vmem>>, vector<1x32xf32>
    %4 = vector.broadcast %3 : vector<1x32xf32> to vector<16x32xf32>
    %5 = arith.addf %2, %4 : vector<16x32xf32>
    %c0_5 = arith.constant 0 : index
    %c0_6 = arith.constant 0 : index
    %6 = vector.load %arg4[%c0_5, %c0_6] : memref<32x32xf32, #tpu.memory_space<vmem>>, vector<32x32xf32>
    %cst_7 = arith.constant dense<0.000000e+00> : vector<16x32xf32>
    %7 = tpu.matmul %5, %6, %cst_7 {dimension_numbers = #tpu.dot_dimension_numbers<[1], [0], [0], [1], [0, 0, 1, 1], [], []>} : vector<16x32xf32>, vector<32x32xf32>, vector<16x32xf32> -> vector<16x32xf32>
    %c0_8 = arith.constant 0 : index
    %c0_9 = arith.constant 0 : index
    %8 = vector.load %arg5[%c0_8, %c0_9] : memref<1x32xf32, #tpu.memory_space<vmem>>, vector<1x32xf32>
    %9 = vector.broadcast %8 : vector<1x32xf32> to vector<16x32xf32>
    %10 = arith.addf %7, %9 : vector<16x32xf32>
    %c0_10 = arith.constant 0 : index
    %c0_11 = arith.constant 0 : index
    %11 = vector.load %arg6[%c0_10, %c0_11] : memref<16x32xf32, #tpu.memory_space<vmem>>, vector<16x32xf32>
    tpu.vector_store %arg6[%c0_10, %c0_11], %10 {strides = array<i32>} : memref<16x32xf32, #tpu.memory_space<vmem>>, vector<16x32xf32>,
    return
  }
  func.func @transform_0(%arg0: i32) -> (i32, i32) {
    %c0_i32 = arith.constant 0 : i32
    %c0_i32_0 = arith.constant 0 : i32
    return %arg0, %c0_i32 : i32, i32
  }
  func.func @transform_1(%arg0: i32) -> (i32, i32) {
    %c0_i32 = arith.constant 0 : i32
    %c0_i32_0 = arith.constant 0 : i32
    %c0_i32_1 = arith.constant 0 : i32
    return %c0_i32, %c0_i32_0 : i32, i32
  }
  func.func @transform_2(%arg0: i32) -> (i32, i32) {
    %c0_i32 = arith.constant 0 : i32
    %c0_i32_0 = arith.constant 0 : i32
    %c0_i32_1 = arith.constant 0 : i32
    return %c0_i32, %c0_i32_0 : i32, i32
  }
  func.func @transform_3(%arg0: i32) -> (i32, i32) {
    %c0_i32 = arith.constant 0 : i32
    %c0_i32_0 = arith.constant 0 : i32
    %c0_i32_1 = arith.constant 0 : i32
    return %c0_i32, %c0_i32_0 : i32, i32
  }
  func.func @transform_4(%arg0: i32) -> (i32, i32) {
    %c0_i32 = arith.constant 0 : i32
    %c0_i32_0 = arith.constant 0 : i32
    %c0_i32_1 = arith.constant 0 : i32
    return %c0_i32, %c0_i32_0 : i32, i32
  }
  func.func @transform_5(%arg0: i32) -> (i32, i32) {
    %c0_i32 = arith.constant 0 : i32
    %c0_i32_0 = arith.constant 0 : i32
    return %arg0, %c0_i32 : i32, i32
  }
}

</mosaic_0001>

<bundles_post_ra>
// kernel: tpu_custom_call.1
= control target key start
LH: loop header
LB: loop body
LE: loop exit
PB: predicated region body
PF: predicated region fallthrough
CT: control target
= control target key end

     0   :  { %10 = vsyncpa [#allocation3], 0  ;;  %s473_s0 = inlined_call_operand.hbm [shape: f32[16,32], index: 0, kind: input, shape index: {}]   ;;  %s474_s1 = inlined_call_operand.hbm [shape: f32[32,32], index: 1, kind: input, shape index: {}]   ;;  %s475_s2 = inlined_call_operand.vmem [shape: f32[1,32], index: 2, kind: input, shape index: {}]   ;;  %s476_s3 = inlined_call_operand.hbm [shape: f32[32,32], index: 3, kind: input, shape index: {}]   ;;  %s477_s4 = inlined_call_operand.vmem [shape: f32[1,32], index: 4, kind: input, shape index: {}]   ;;  %s478_s5 = inlined_call_operand.hbm [shape: f32[16,32], index: 5, kind: output, shape index: {}]  }
   0x1   :  { %11 = vsyncpa [#allocation6], 0 }
   0x2   :  { %12 = vsyncpa [#allocation4], 0  ;;  %s401_s18 = smov [#allocation5]   ;;  %s402_s20 = smov [#allocation2]  }
   0x3   :  { %s30_s19 = sshll.u32 %s401_s18, 4  ;;  %s18_s21 = sshll.u32 %s402_s20, 4  ;;  %s31_s19 = int_to_ptr.vmem [resolvable:$true] %s30_s19  ;;  %s19_s21 = int_to_ptr.vmem [resolvable:$true] %s18_s21 }
   0x4   :  { %s323_s22 = scalar_lea.vmem %s31_s19, 512  ;;  %p328_p1 = scmp.lt.s32.totalorder %s31_s19, %s31_s19 }
   0x5   :  { %p324_p0 = scmp.ne.s32.totalorder %s31_s19, %s323_s22  ;;  %p329_p2 = scmp.lt.s32.totalorder %s323_s22, %s323_s22 }
   0x7   :  { %p330_p3 = por %p329_p2, %p328_p1 }
   0x9   :  { %p331_p4 = pnand %p330_p3, %p324_p0 }
   0xb   :  { %334 = shalt.err (!%p331_p4)
}
   0xc   :  { %s403_s23 = smov 128   ;;  %s404_s24 = smov 8  }
   0xd   :  { %36 = dma.hbm_to_vmem [thread:$0]  %s474_s1, 512, %s31_s19, [#allocation6], %s403_s23, %s403_s23, %s404_s24  }
   0xe   :  { %s343_s27 = scalar_lea.vmem %s19_s21, 256  ;;  %p348_p6 = scmp.lt.s32.totalorder %s19_s21, %s19_s21 }
   0xf   :  { %p344_p5 = scmp.ne.s32.totalorder %s19_s21, %s343_s27  ;;  %p349_p7 = scmp.lt.s32.totalorder %s343_s27, %s343_s27 }
  0x11   :  { %p350_p8 = por %p349_p7, %p348_p6 }
  0x13   :  { %p351_p9 = pnand %p350_p8, %p344_p5 }
  0x15   :  { %354 = shalt.err (!%p351_p9)
}
  0x16   :  { %24 = dma.hbm_to_vmem [thread:$0]  %s473_s0, 256, %s19_s21, [#allocation3], %s403_s23, %s403_s23, %s404_s24  }
  0x17   :  { %s405_s30 = smov [#allocation7]  }
  0x18   :  { %s44_s6 = sshll.u32 %s405_s30, 4  ;;  %s45_s6 = int_to_ptr.vmem [resolvable:$true] %s44_s6 }
  0x19   :  { %s363_s7 = scalar_lea.vmem %s45_s6, 512  ;;  %p368_p11 = scmp.lt.s32.totalorder %s45_s6, %s45_s6 }
  0x1a   :  { %p364_p10 = scmp.ne.s32.totalorder %s45_s6, %s363_s7  ;;  %p369_p12 = scmp.lt.s32.totalorder %s363_s7, %s363_s7 }
  0x1c   :  { %p370_p13 = por %p369_p12, %p368_p11 }
  0x1e   :  { %p371_p0 = pnand %p370_p13, %p364_p10 }
  0x20   :  { %374 = shalt.err (!%p371_p0)
}
  0x21   :  { %50 = dma.hbm_to_vmem [thread:$0]  %s476_s3, 512, %s45_s6, [#allocation6], %s403_s23, %s403_s23, %s404_s24  }
  0x22   :  { %395 = dma.done.wait [#allocation3], 256  }
  0x23   :  { %396 = vsyncadd [#allocation3], 4294967040 }
  0x24   :  { %397 = dma.done.wait [#allocation6], 1024  }
  0x25   :  { %398 = vsyncadd [#allocation6], 4294966272  ;;  %vm75_vm0 = vcmask 261120   ;;  %v67_v0 = vld [vmem:[#allocation5 + $0x18] sm:$0xff]  ;;  %v66_v1 = vld [vmem:[#allocation5 + $0x10] sm:$0xff]  ;;  %s406_s11 = smov [#allocation8]  }
  0x26   :  { %287 = vmatprep.subr.mxu0 %v67_v0  ;;  %v62_v2 = vld [vmem:[#allocation2] sm:$0xff]  ;;  %v65_v3 = vld [vmem:[#allocation5 + $0x8] sm:$0xff]  ;;  %v160_v4 = vld [vmem:[#allocation7 + $0x18] sm:$0xff]  ;;  %s256_s12 = sshll.u32 %s406_s11, 4  ;;  %s257_s12 = int_to_ptr.vmem [resolvable:$true] %s256_s12 }
  0x27   :  { %288 = vmatpush3.msra.mxu0 %v67_v0  ;;  %295 = vmatprep.mubr.msk.f32.mxu0 %vm75_vm0, %v62_v2  ;;  %v64_v5 = vld [vmem:[#allocation5] sm:$0xff]  ;;  %v63_v6 = vld [vmem:[#allocation2 + $0x8] sm:$0xff]  ;;  %v159_v7 = vld [vmem:[#allocation7 + $0x10] sm:$0xff]  ;;  %p380_p2 = scmp.lt.s32.totalorder %s257_s12, %s257_s12 }
  0x28   :  { %289 = vmatprep.subr.mxu0 %v66_v1  ;;  %298 = vmatprep.subr.mxu1 %v160_v4  ;;  %v158_v8 = vld [vmem:[#allocation7 + $0x8] sm:$0xff]  ;;  %v157_v9 = vld [vmem:[#allocation7] sm:$0xff]  ;;  %v269_v11 = vld [vmem:[%s475_s2] ss:$0 sm:$0xff]  ;;  %s375_s2 = scalar_lea.vmem %s257_s12, 256 }
  0x29   :  { %290 = vmatpush3.msra.mxu0 %v66_v1  ;;  %299 = vmatpush3.msra.mxu1 %v160_v4  ;;  %v272_v15 = vld [vmem:[%s477_s4] ss:$0 sm:$0xff]  ;;  %p376_p1 = scmp.ne.s32.totalorder %s257_s12, %s375_s2  ;;  %p381_p3 = scmp.lt.s32.totalorder %s375_s2, %s375_s2 }
  0x2a   :  { %291 = vmatprep.subr.mxu0 %v65_v3  ;;  %300 = vmatprep.subr.mxu1 %v159_v7 }
  0x2b   :  { %292 = vmatpush3.msra.mxu0 %v65_v3  ;;  %301 = vmatpush3.msra.mxu1 %v159_v7  ;;  %p382_p4 = por %p381_p3, %p380_p2 }
  0x2c   :  { %293 = vmatprep.subr.mxu0 %v64_v5  ;;  %302 = vmatprep.subr.mxu1 %v158_v8 }
  0x2d   :  { %294 = vmatpush3.msra.mxu0 %v64_v5  ;;  %303 = vmatpush3.msra.mxu1 %v158_v8  ;;  %p383_p5 = pnand %p382_p4, %p376_p1 }
  0x2e   :  { %296 = vmatmul.mubr.msk.f32.vlgmr.msra.gmra.mxu0 %vm75_vm0, %v63_v6  ;;  %304 = vmatprep.subr.mxu1 %v157_v9 }
  0x2f   :  { %305 = vmatpush3.msra.mxu1 %v157_v9 }
  0xee   :  { %v297_v10 = vpop.f32.mrf.mxu0 }
  0xef   :  { %v154_v14 = vadd.f32 %v297_v10, %v269_v11 }
  0xf0   :  { %v148_v12 = vpop.f32.mrf.mxu0 }
  0xf1   :  { %v149_v13 = vadd.f32 %v269_v11, %v148_v12 }
  0xf3   :  { %306 = vmatprep.mubr.msk.f32.mxu1 %vm75_vm0, %v149_v13 }
  0xf4   :  { %307 = vmatmul.mubr.msk.f32.vlgmr.msra.gmra.mxu1 %vm75_vm0, %v154_v14 }
 0x1b4   :  { %v308_v16 = vpop.f32.mrf.mxu1 }
 0x1b5   :  { %v246_v17 = vadd.f32 %v308_v16, %v272_v15 }
 0x1b6   :  { %v240_v18 = vpop.f32.mrf.mxu1 }
 0x1b7   :  { %250 = vst.msk [vmem:[#allocation8 + $0x8] sm:$0xff] %vm75_vm0, %v246_v17  ;;  %v241_v19 = vadd.f32 %v272_v15, %v240_v18 }
 0x1b9   :  { %249 = vst.msk [vmem:[#allocation8] sm:$0xff] %vm75_vm0, %v241_v19 }
 0x1ba   :  { %386 = shalt.err (!%p383_p5)
}
 0x1bb   :  { %262 = dma.vmem_to_hbm [thread:$0]  %s257_s12, 256, %s478_s5, [#allocation4], %s403_s23, %s403_s23, %s404_s24  }
 0x1bc   :  { %399 = dma.done.wait [#allocation4], 256  }
 0x1bd   :  { %400 = vsyncadd [#allocation4], 4294967040 }
 0x1be   :  { %266 = vsyncpa [#allocation3], 1 }
 0x1bf   :  { %267 = vsyncpa [#allocation6], 1 }
 0x1c0   :  { %268 = vsyncpa [#allocation4], 1 }

</bundles_post_ra>
